<compile_context>
chip_gen: v6e
topology: v6e:2x2x1
jax: 0.10.0
libtpu: 0.0.40
codegen_flags: <defaults>
</compile_context>

<pallas_src>
import jax
import jax.numpy as jnp
from jax.experimental import pallas as pl
from jax.experimental.pallas import tpu as pltpu


def _round_up(x, m):
    return (x + m - 1) // m * m


def _sigmoid(x):
    # Mathematically identical to sigmoid; one EUP tanh instead of exp + divide.
    return 0.5 * jnp.tanh(0.5 * x) + 0.5


def mlp_kernel(ui_ref, w1_ref, b1_ref, w2_ref, b2_ref, wl_ref, bl_ref, o_ref):
    # Layer 1: single K=2E matmul on the pre-concatenated (tb, 2E) block.
    pre1 = (jnp.dot(ui_ref[...].astype(jnp.bfloat16), w1_ref[...],
                    preferred_element_type=jnp.float32)
            + b1_ref[...])
    h = _sigmoid(pre1)                                          # f32 (tb, Hp)

    # Hidden layer (num_layers=2 -> exactly one extra Linear + sigmoid).
    pre2 = (jnp.dot(h.astype(jnp.bfloat16), w2_ref[...],
                    preferred_element_type=jnp.float32)
            + b2_ref[...])
    h = _sigmoid(pre2)                                          # f32 (tb, Hp)

    # Last layer (out_features=1): VPU multiply + lane reduction (no (Hp,1)
    # weight padded to 128 lanes), stored lane-dense as a (1, tb) row.
    r = jnp.sum(h * wl_ref[...], axis=-1)                       # (tb,) f32
    o_ref[...] = r[None, :] + bl_ref[...]                       # (1, tb)


def init_params(key, emsize, hidden_size=400, num_layers=2):
    """Faithful to MLP.init_weights: uniform(-0.1, 0.1) weights, zero biases.
    Weights stored pre-transposed as (in_features, out_features), f32."""
    del num_layers  # kernel supports the default num_layers=2 (one hidden layer)
    initrange = 0.1
    k1, k2, k3 = jax.random.split(key, 3)
    w1 = jax.random.uniform(k1, (emsize * 2, hidden_size), jnp.float32,
                            -initrange, initrange)
    b1 = jnp.zeros((1, hidden_size), jnp.float32)
    w2 = jax.random.uniform(k2, (hidden_size, hidden_size), jnp.float32,
                            -initrange, initrange)
    b2 = jnp.zeros((1, hidden_size), jnp.float32)
    wl = jax.random.uniform(k3, (hidden_size, 1), jnp.float32,
                            -initrange, initrange)
    bl = jnp.zeros((1, 1), jnp.float32)
    return (w1, b1, w2, b2, wl, bl)


def prepare_params(params_f32, emsize, hidden_size):
    """Kernel-layout params: zero-pad hidden to a multiple of 128, lane-dense
    (1, Hp) Wl (kept f32), bf16 matmul weights / f32 biases."""
    del emsize
    w1, b1, w2, b2, wl, bl = params_f32
    hp = _round_up(hidden_size, 128)
    ph = hp - hidden_size
    w1p = jnp.pad(w1, ((0, 0), (0, ph))).astype(jnp.bfloat16)      # (2E, Hp)
    b1p = jnp.pad(b1, ((0, 0), (0, ph)))                            # (1, Hp) f32
    w2p = jnp.pad(w2, ((0, ph), (0, ph))).astype(jnp.bfloat16)      # (Hp, Hp)
    b2p = jnp.pad(b2, ((0, 0), (0, ph)))                            # (1, Hp) f32
    wlp = jnp.pad(wl.T, ((0, 0), (0, ph)))                          # (1, Hp) f32
    return (w1p, b1p, w2p, b2p, wlp, bl)


def mlp_forward(user, item, prepared, *, block_b=256):
    """user, item: (B, emsize) float32. Returns (B,) ratings (float32)."""
    w1, b1, w2, b2, wl, bl = prepared
    B, _ = user.shape
    E2, Hp = w1.shape

    # One concat on the tiny (B, 2E) activation, done in the wrapper (no
    # in-kernel concat; enables a single K=2E MXU pass for layer 1).
    ui = jnp.concatenate([user, item], axis=1)                      # (B, 2E) f32

    # Batch tile: whole batch in a single grid step when it fits (avoids
    # duplicating the resident-weight DMA across megacore cores / per-step
    # overhead at small B); otherwise lane-aligned 128-multiple tiles.
    Bp8 = _round_up(B, 8)
    if Bp8 <= block_b:
        tb = Bp8
    else:
        tb = max(128, (block_b // 128) * 128)
    Bp = _round_up(B, tb)
    if Bp != B:
        ui = jnp.pad(ui, ((0, Bp - B), (0, 0)))
    grid = (Bp // tb,)

    flops = 2 * Bp * (E2 * Hp + Hp * Hp + Hp)
    bytes_accessed = (sum(int(a.nbytes) for a in prepared)
                      + int(ui.nbytes) + Bp * 4)

    out = pl.pallas_call(
        mlp_kernel,
        out_shape=jax.ShapeDtypeStruct((1, Bp), jnp.float32),
        grid=grid,
        in_specs=[
            pl.BlockSpec((tb, E2), lambda i: (i, 0)),    # [user|item] (batch tiled)
            pl.BlockSpec((E2, Hp), lambda i: (0, 0)),    # W1          resident
            pl.BlockSpec((1, Hp), lambda i: (0, 0)),     # b1          resident
            pl.BlockSpec((Hp, Hp), lambda i: (0, 0)),    # W2          resident
            pl.BlockSpec((1, Hp), lambda i: (0, 0)),     # b2          resident
            pl.BlockSpec((1, Hp), lambda i: (0, 0)),     # Wl lane-dense, resident
            pl.BlockSpec((1, 1), lambda i: (0, 0)),      # bl          resident
        ],
        out_specs=pl.BlockSpec((1, tb), lambda i: (0, i)),  # lane-dense output row
        compiler_params=pltpu.CompilerParams(
            dimension_semantics=("parallel",)),             # megacore only if >1 tile
        cost_estimate=pl.CostEstimate(
            flops=flops, transcendentals=2 * Bp * Hp,
            bytes_accessed=bytes_accessed),
    )(ui, w1, b1, w2, b2, wl, bl)

    # torch.squeeze on (B, 1) -> (B,)
    return out[0, :B]


def mlp_reference_f32(user, item, params_f32):
    """Pure-f32 JAX reference of the PyTorch forward."""
    w1, b1, w2, b2, wl, bl = params_f32
    ui = jnp.concatenate([user, item], axis=1)
    h = jax.nn.sigmoid(ui @ w1 + b1)
    h = jax.nn.sigmoid(h @ w2 + b2)
    return jnp.squeeze(h @ wl + bl)


def mlp_reference_prepared(user, item, prepared):
    """Reference matching the kernel's numeric path (bf16 MXU inputs, f32 accum)."""
    w1, b1, w2, b2, wl, bl = prepared
    ui = jnp.concatenate([user, item], axis=1).astype(jnp.bfloat16)
    h = jax.nn.sigmoid(jnp.dot(ui, w1, preferred_element_type=jnp.float32) + b1)
    h = jax.nn.sigmoid(jnp.dot(h.astype(jnp.bfloat16), w2,
                               preferred_element_type=jnp.float32) + b2)
    return jnp.sum(h * wl, axis=-1) + bl[0, 0]


if __name__ == "__main__":
    B, EMSIZE, HIDDEN = 8, 32, 400  # module defaults (hidden_size=400, num_layers=2)

    key = jax.random.PRNGKey(0)
    k_params, k_user, k_item = jax.random.split(key, 3)

    params_f32 = init_params(k_params, EMSIZE, HIDDEN, num_layers=2)
    prepared = prepare_params(params_f32, EMSIZE, HIDDEN)

    user = jax.random.normal(k_user, (B, EMSIZE), jnp.float32)
    item = jax.random.normal(k_item, (B, EMSIZE), jnp.float32)

    rating = jax.block_until_ready(mlp_forward(user, item, prepared))
    ref_kernel_path = mlp_reference_prepared(user, item, prepared)
    ref_f32 = mlp_reference_f32(user, item, params_f32)

    assert rating.shape == (B,), rating.shape
    # Tight check against the same bf16-weight numeric path.
    assert jnp.allclose(rating, ref_kernel_path, atol=1e-3, rtol=1e-3), (
        rating, ref_kernel_path)
    # Loose sanity check against the pure-f32 module semantics.
    assert jnp.allclose(rating, ref_f32, atol=5e-2, rtol=5e-2), (rating, ref_f32)
    print("KERNEL_OK")
</pallas_src>

<mosaic_0001>
module attributes {stable_mosaic.version = 11 : i64} {
  func.func @mlp_kernel(%arg0: i32, %arg1: memref<8x64xf32, #tpu.memory_space<vmem>>, %arg2: memref<64x512xbf16, #tpu.memory_space<vmem>>, %arg3: memref<1x512xf32, #tpu.memory_space<vmem>>, %arg4: memref<512x512xbf16, #tpu.memory_space<vmem>>, %arg5: memref<1x512xf32, #tpu.memory_space<vmem>>, %arg6: memref<1x512xf32, #tpu.memory_space<vmem>>, %arg7: memref<1x1xf32, #tpu.memory_space<vmem>>, %arg8: memref<1x8xf32, #tpu.memory_space<vmem>>) attributes {dimension_semantics = [#tpu.dimension_semantics<parallel>], iteration_bounds = array<i64: 1>, scalar_prefetch = 0 : i64, scratch_operands = 0 : i64, tpu.core_type = #tpu.core_type<tc>, window_params = [{transform_indices = @transform_0, window_bounds = array<i64: 8, 64>}, {pipeline_mode = #tpu.pipeline_mode<synchronous>, transform_indices = @transform_1, window_bounds = array<i64: 64, 512>}, {pipeline_mode = #tpu.pipeline_mode<synchronous>, transform_indices = @transform_2, window_bounds = array<i64: 1, 512>}, {pipeline_mode = #tpu.pipeline_mode<synchronous>, transform_indices = @transform_3, window_bounds = array<i64: 512, 512>}, {pipeline_mode = #tpu.pipeline_mode<synchronous>, transform_indices = @transform_4, window_bounds = array<i64: 1, 512>}, {pipeline_mode = #tpu.pipeline_mode<synchronous>, transform_indices = @transform_5, window_bounds = array<i64: 1, 512>}, {pipeline_mode = #tpu.pipeline_mode<synchronous>, transform_indices = @transform_6, window_bounds = array<i64: 1, 1>}, {transform_indices = @transform_7, window_bounds = array<i64: 1, 8>}]} {
    %c0 = arith.constant 0 : index
    %c0_0 = arith.constant 0 : index
    %0 = vector.load %arg1[%c0, %c0_0] : memref<8x64xf32, #tpu.memory_space<vmem>>, vector<8x64xf32>
    %1 = arith.truncf %0 : vector<8x64xf32> to vector<8x64xbf16>
    %c0_1 = arith.constant 0 : index
    %c0_2 = arith.constant 0 : index
    %2 = vector.load %arg2[%c0_1, %c0_2] : memref<64x512xbf16, #tpu.memory_space<vmem>>, vector<64x512xbf16>
    %cst = arith.constant dense<0.000000e+00> : vector<8x512xf32>
    %3 = tpu.matmul %1, %2, %cst {dimension_numbers = #tpu.dot_dimension_numbers<[1], [0], [0], [1], [0, 0, 1, 1], [], []>} : vector<8x64xbf16>, vector<64x512xbf16>, vector<8x512xf32> -> vector<8x512xf32>
    %c0_3 = arith.constant 0 : index
    %c0_4 = arith.constant 0 : index
    %4 = vector.load %arg3[%c0_3, %c0_4] : memref<1x512xf32, #tpu.memory_space<vmem>>, vector<1x512xf32>
    %5 = vector.broadcast %4 : vector<1x512xf32> to vector<8x512xf32>
    %6 = arith.addf %3, %5 : vector<8x512xf32>
    %cst_5 = arith.constant 5.000000e-01 : f32
    %7 = vector.broadcast %cst_5 : f32 to vector<8x512xf32>
    %8 = arith.mulf %7, %6 : vector<8x512xf32>
    %9 = math.tanh %8 : vector<8x512xf32>
    %cst_6 = arith.constant 5.000000e-01 : f32
    %10 = vector.broadcast %cst_6 : f32 to vector<8x512xf32>
    %11 = arith.mulf %10, %9 : vector<8x512xf32>
    %cst_7 = arith.constant 5.000000e-01 : f32
    %12 = vector.broadcast %cst_7 : f32 to vector<8x512xf32>
    %13 = arith.addf %11, %12 : vector<8x512xf32>
    %14 = arith.truncf %13 : vector<8x512xf32> to vector<8x512xbf16>
    %c0_8 = arith.constant 0 : index
    %c0_9 = arith.constant 0 : index
    %15 = vector.load %arg4[%c0_8, %c0_9] : memref<512x512xbf16, #tpu.memory_space<vmem>>, vector<512x512xbf16>
    %cst_10 = arith.constant dense<0.000000e+00> : vector<8x512xf32>
    %16 = tpu.matmul %14, %15, %cst_10 {dimension_numbers = #tpu.dot_dimension_numbers<[1], [0], [0], [1], [0, 0, 1, 1], [], []>} : vector<8x512xbf16>, vector<512x512xbf16>, vector<8x512xf32> -> vector<8x512xf32>
    %c0_11 = arith.constant 0 : index
    %c0_12 = arith.constant 0 : index
    %17 = vector.load %arg5[%c0_11, %c0_12] : memref<1x512xf32, #tpu.memory_space<vmem>>, vector<1x512xf32>
    %18 = vector.broadcast %17 : vector<1x512xf32> to vector<8x512xf32>
    %19 = arith.addf %16, %18 : vector<8x512xf32>
    %cst_13 = arith.constant 5.000000e-01 : f32
    %20 = vector.broadcast %cst_13 : f32 to vector<8x512xf32>
    %21 = arith.mulf %20, %19 : vector<8x512xf32>
    %22 = math.tanh %21 : vector<8x512xf32>
    %cst_14 = arith.constant 5.000000e-01 : f32
    %23 = vector.broadcast %cst_14 : f32 to vector<8x512xf32>
    %24 = arith.mulf %23, %22 : vector<8x512xf32>
    %cst_15 = arith.constant 5.000000e-01 : f32
    %25 = vector.broadcast %cst_15 : f32 to vector<8x512xf32>
    %26 = arith.addf %24, %25 : vector<8x512xf32>
    %c0_16 = arith.constant 0 : index
    %c0_17 = arith.constant 0 : index
    %27 = vector.load %arg6[%c0_16, %c0_17] : memref<1x512xf32, #tpu.memory_space<vmem>>, vector<1x512xf32>
    %28 = vector.broadcast %27 : vector<1x512xf32> to vector<8x512xf32>
    %29 = arith.mulf %26, %28 : vector<8x512xf32>
    %cst_18 = arith.constant dense<0.000000e+00> : vector<8xf32>
    %30 = vector.multi_reduction <add>, %29, %cst_18 [1] : vector<8x512xf32> to vector<8xf32>
    %31 = vector.shape_cast %30 : vector<8xf32> to vector<1x8xf32>
    %c0_19 = arith.constant 0 : index
    %c0_20 = arith.constant 0 : index
    %32 = vector.load %arg7[%c0_19, %c0_20] : memref<1x1xf32, #tpu.memory_space<vmem>>, vector<1x1xf32>
    %33 = vector.broadcast %32 : vector<1x1xf32> to vector<1x8xf32>
    %34 = arith.addf %31, %33 : vector<1x8xf32>
    %c0_21 = arith.constant 0 : index
    %c0_22 = arith.constant 0 : index
    %35 = vector.load %arg8[%c0_21, %c0_22] : memref<1x8xf32, #tpu.memory_space<vmem>>, vector<1x8xf32>
    tpu.vector_store %arg8[%c0_21, %c0_22], %34 {strides = array<i32>} : memref<1x8xf32, #tpu.memory_space<vmem>>, vector<1x8xf32>,
    return
  }
  func.func @transform_0(%arg0: i32) -> (i32, i32) {
    %c0_i32 = arith.constant 0 : i32
    %c0_i32_0 = arith.constant 0 : i32
    return %arg0, %c0_i32 : i32, i32
  }
  func.func @transform_1(%arg0: i32) -> (i32, i32) {
    %c0_i32 = arith.constant 0 : i32
    %c0_i32_0 = arith.constant 0 : i32
    %c0_i32_1 = arith.constant 0 : i32
    return %c0_i32, %c0_i32_0 : i32, i32
  }
  func.func @transform_2(%arg0: i32) -> (i32, i32) {
    %c0_i32 = arith.constant 0 : i32
    %c0_i32_0 = arith.constant 0 : i32
    %c0_i32_1 = arith.constant 0 : i32
    return %c0_i32, %c0_i32_0 : i32, i32
  }
  func.func @transform_3(%arg0: i32) -> (i32, i32) {
    %c0_i32 = arith.constant 0 : i32
    %c0_i32_0 = arith.constant 0 : i32
    %c0_i32_1 = arith.constant 0 : i32
    return %c0_i32, %c0_i32_0 : i32, i32
  }
  func.func @transform_4(%arg0: i32) -> (i32, i32) {
    %c0_i32 = arith.constant 0 : i32
    %c0_i32_0 = arith.constant 0 : i32
    %c0_i32_1 = arith.constant 0 : i32
    return %c0_i32, %c0_i32_0 : i32, i32
  }
  func.func @transform_5(%arg0: i32) -> (i32, i32) {
    %c0_i32 = arith.constant 0 : i32
    %c0_i32_0 = arith.constant 0 : i32
    %c0_i32_1 = arith.constant 0 : i32
    return %c0_i32, %c0_i32_0 : i32, i32
  }
  func.func @transform_6(%arg0: i32) -> (i32, i32) {
    %c0_i32 = arith.constant 0 : i32
    %c0_i32_0 = arith.constant 0 : i32
    %c0_i32_1 = arith.constant 0 : i32
    return %c0_i32, %c0_i32_0 : i32, i32
  }
  func.func @transform_7(%arg0: i32) -> (i32, i32) {
    %c0_i32 = arith.constant 0 : i32
    %c0_i32_0 = arith.constant 0 : i32
    return %c0_i32, %arg0 : i32, i32
  }
}

</mosaic_0001>

<bundles_post_ra>
// kernel: tpu_custom_call.1
= control target key start
LH: loop header
LB: loop body
LE: loop exit
PB: predicated region body
PF: predicated region fallthrough
CT: control target
= control target key end

     0   :  { %s1951_s0 = inlined_call_operand.hbm [shape: f32[8,64], index: 0, kind: input, shape index: {}]   ;;  %s1952_s1 = inlined_call_operand.hbm [shape: bf16[64,512], index: 1, kind: input, shape index: {}]   ;;  %s1953_s2 = inlined_call_operand.vmem [shape: f32[1,512], index: 2, kind: input, shape index: {}]   ;;  %s1954_s3 = inlined_call_operand.hbm [shape: bf16[512,512], index: 3, kind: input, shape index: {}]   ;;  %s1955_s4 = inlined_call_operand.vmem [shape: f32[1,512], index: 4, kind: input, shape index: {}]   ;;  %s1956_s5 = inlined_call_operand.hbm [shape: f32[1,512], index: 5, kind: input, shape index: {}]   ;;  %s1957_s6 = inlined_call_operand.<no memory space> [shape: f32[1,1], index: 6, kind: input, shape index: {}]   ;;  %s1958_s7 = inlined_call_operand.hbm [shape: f32[1,8], index: 7, kind: output, shape index: {}]  }
   0x1   :  { %v12_v0 = vstv %s1957_s6 }
   0x2   :  { %13 = vst [vmem:[#allocation2] sm:$0x1] %v12_v0 }
   0x3   :  { %14 = vsyncpa [#allocation4], 0 }
   0x4   :  { %15 = vsyncpa [#allocation7], 0 }
   0x5   :  { %16 = vsyncpa [#allocation10], 0 }
   0x6   :  { %17 = vsyncpa [#allocation5], 0  ;;  %s1841_s26 = smov [#allocation6]  }
   0x7   :  { %s33_s27 = sshll.u32 %s1841_s26, 4  ;;  %s34_s27 = int_to_ptr.vmem [resolvable:$true] %s33_s27 }
   0x8   :  { %s1741_s28 = scalar_lea.vmem %s34_s27, 2048  ;;  %p1746_p1 = scmp.lt.s32.totalorder %s34_s27, %s34_s27 }
   0x9   :  { %p1742_p0 = scmp.ne.s32.totalorder %s34_s27, %s1741_s28  ;;  %p1747_p2 = scmp.lt.s32.totalorder %s1741_s28, %s1741_s28 }
   0xb   :  { %p1748_p3 = por %p1747_p2, %p1746_p1 }
   0xd   :  { %p1749_p4 = pnand %p1748_p3, %p1742_p0 }
   0xf   :  { %1752 = shalt.err (!%p1749_p4)
}
  0x10   :  { %s1842_s29 = smov 256   ;;  %s1843_s30 = smov 16  }
  0x11   :  { %39 = dma.hbm_to_vmem [thread:$0]  %s1952_s1, 2048, %s34_s27, [#allocation7], %s1842_s29, %s1842_s29, %s1843_s30  }
  0x12   :  { %s1844_s6 = smov [#allocation3]   ;;  %s1845_s11 = smov [#allocation8]  }
  0x13   :  { %s24_s10 = sshll.u32 %s1844_s6, 4  ;;  %s47_s12 = sshll.u32 %s1845_s11, 4  ;;  %s25_s10 = int_to_ptr.vmem [resolvable:$true] %s24_s10  ;;  %s48_s12 = int_to_ptr.vmem [resolvable:$true] %s47_s12 }
  0x14   :  { %s1761_s13 = scalar_lea.vmem %s25_s10, 128  ;;  %p1766_p6 = scmp.lt.s32.totalorder %s25_s10, %s25_s10 }
  0x15   :  { %p1762_p5 = scmp.ne.s32.totalorder %s25_s10, %s1761_s13  ;;  %p1767_p7 = scmp.lt.s32.totalorder %s1761_s13, %s1761_s13 }
  0x17   :  { %p1768_p8 = por %p1767_p7, %p1766_p6 }
  0x19   :  { %p1769_p9 = pnand %p1768_p8, %p1762_p5 }
  0x1b   :  { %1772 = shalt.err (!%p1769_p9)
}
  0x1c   :  { %27 = dma.hbm_to_vmem [thread:$0]  %s1951_s0, 128, %s25_s10, [#allocation4]  }
  0x1d   :  { %s1781_s16 = scalar_lea.vmem %s48_s12, 16384  ;;  %p1786_p11 = scmp.lt.s32.totalorder %s48_s12, %s48_s12 }
  0x1e   :  { %p1782_p10 = scmp.ne.s32.totalorder %s48_s12, %s1781_s16  ;;  %p1787_p12 = scmp.lt.s32.totalorder %s1781_s16, %s1781_s16 }
  0x20   :  { %p1788_p13 = por %p1787_p12, %p1786_p11 }
  0x22   :  { %p1789_p0 = pnand %p1788_p13, %p1782_p10 }
  0x24   :  { %1792 = shalt.err (!%p1789_p0)
}
  0x25   :  { %53 = dma.hbm_to_vmem [thread:$0]  %s1954_s3, 16384, %s48_s12, [#allocation7], %s1842_s29, %s1842_s29, %s1843_s30  }
  0x26   :  { %s1846_s18 = smov [#allocation9]  }
  0x27   :  { %s62_s19 = sshll.u32 %s1846_s18, 4  ;;  %s63_s19 = int_to_ptr.vmem [resolvable:$true] %s62_s19 }
  0x28   :  { %s1801_s20 = scalar_lea.vmem %s63_s19, 64  ;;  %p1806_p2 = scmp.lt.s32.totalorder %s63_s19, %s63_s19 }
  0x29   :  { %p1802_p1 = scmp.ne.s32.totalorder %s63_s19, %s1801_s20  ;;  %p1807_p3 = scmp.lt.s32.totalorder %s1801_s20, %s1801_s20 }
  0x2b   :  { %p1808_p4 = por %p1807_p3, %p1806_p2 }
  0x2d   :  { %p1809_p5 = pnand %p1808_p4, %p1802_p1 }
  0x2f   :  { %1812 = shalt.err (!%p1809_p5)
}
  0x30   :  { %65 = dma.hbm_to_vmem [thread:$0]  %s1956_s5, 64, %s63_s19, [#allocation10]  }
  0x31   :  { %1833 = dma.done.wait [#allocation4], 128  }
  0x32   :  { %1834 = vsyncadd [#allocation4], 4294967168 }
  0x33   :  { %1835 = dma.done.wait [#allocation7], 18432  }
  0x34   :  { %1836 = vsyncadd [#allocation7], 4294948864 }
  0x35   :  { %1837 = dma.done.wait [#allocation10], 64  }
  0x36   :  { %1838 = vsyncadd [#allocation10], 4294967232  ;;  %v1847_v1 = vmov 0   ;;  %v1501_v2 = vld [vmem:[#allocation6 + $0x64] ss:$16 sps:$4 sm:$0xff]   ;;  %v81_v18 = vld [vmem:[#allocation3] sm:$0xff] }
  0x37   :  { %237 = vmatprep.mubr.bf16.mxu0 %v1847_v1  ;;  %278 = vmatprep.mubr.bf16.mxu1 %v1847_v1  ;;  %v1503_v3 = vld [vmem:[#allocation6 + $0x6c] ss:$16 sps:$4 sm:$0xff]   ;;  %v1505_v4 = vld [vmem:[#allocation6 + $0x60] ss:$16 sps:$4 sm:$0xff]   ;;  %v1506_v5 = vld [vmem:[#allocation6 + $0x68] ss:$16 sps:$4 sm:$0xff]   ;;  %v82_v21 = vpack.c.bf16 %v81_v18, %v81_v18 }
  0x38   :  { %1500 = vset.pattern.permute.xlu0 %v1847_v1  ;;  %213 = vmatprep.subr.bf16.mxu0 %v1501_v2  ;;  %v1507_v6 = vld [vmem:[#allocation6 + $0x44] ss:$16 sps:$4 sm:$0xff]   ;;  %v1509_v7 = vld [vmem:[#allocation6 + $0x4c] ss:$16 sps:$4 sm:$0xff]   ;;  %v1511_v8 = vld [vmem:[#allocation6 + $0x40] ss:$16 sps:$4 sm:$0xff]  }
  0x39   :  { %254 = vmatprep.subr.bf16.mxu1 %v1503_v3  ;;  %214 = vmatpush1.bf16.msra.mxu0 %v1505_v4  ;;  %v1512_v9 = vld [vmem:[#allocation6 + $0x48] ss:$16 sps:$4 sm:$0xff]   ;;  %v1513_v10 = vld [vmem:[#allocation6 + $0x24] ss:$16 sps:$4 sm:$0xff]   ;;  %v1515_v11 = vld [vmem:[#allocation6 + $0x2c] ss:$16 sps:$4 sm:$0xff]  }
  0x3a   :  { %255 = vmatpush1.bf16.msra.mxu1 %v1506_v5  ;;  %215 = vmatprep.subr.bf16.mxu0 %v1507_v6  ;;  %v1517_v12 = vld [vmem:[#allocation6 + $0x20] ss:$16 sps:$4 sm:$0xff]   ;;  %v1518_v13 = vld [vmem:[#allocation6 + $0x28] ss:$16 sps:$4 sm:$0xff]   ;;  %v1519_v14 = vld [vmem:[#allocation6 + $0x4] ss:$16 sps:$4 sm:$0xff]  }
  0x3b   :  { %256 = vmatprep.subr.bf16.mxu1 %v1509_v7  ;;  %v1521_v15 = vld [vmem:[#allocation6 + $0xc] ss:$16 sps:$4 sm:$0xff]   ;;  %v1523_v16 = vld [vmem:[#allocation6] ss:$16 sps:$4 sm:$0xff]   ;;  %v1524_v17 = vld [vmem:[#allocation6 + $0x8] ss:$16 sps:$4 sm:$0xff]  }
  0x3c   :  { %v1527_v19 = vld [vmem:[#allocation8 + $0xe4] ss:$16 sps:$4 sm:$0xff]   ;;  %v1525_v22 = vld [vmem:[#allocation8 + $0xe0] ss:$16 sps:$4 sm:$0xff]   ;;  %vm201_vm0 = vcmask 523264   ;;  %vm1327_vm1 = vcmask 57344  }
  0x3d   :  { %216 = vmatpush1.bf16.msra.mxu0 %v1511_v8  ;;  %v1530_v20 = vld [vmem:[#allocation8 + $0x2e4] ss:$16 sps:$4 sm:$0xff]   ;;  %v1528_v23 = vld [vmem:[#allocation8 + $0x2e0] ss:$16 sps:$4 sm:$0xff]  }
  0x3e   :  { %257 = vmatpush1.bf16.msra.mxu1 %v1512_v9  ;;  %217 = vmatprep.subr.bf16.mxu0 %v1513_v10  ;;  %v1533_v24 = vld [vmem:[#allocation8 + $0xc4] ss:$16 sps:$4 sm:$0xff]   ;;  %v1531_v26 = vld [vmem:[#allocation8 + $0xc0] ss:$16 sps:$4 sm:$0xff]  }
  0x3f   :  { %258 = vmatprep.subr.bf16.mxu1 %v1515_v11  ;;  %v1536_v25 = vld [vmem:[#allocation8 + $0x2c4] ss:$16 sps:$4 sm:$0xff]   ;;  %v1534_v27 = vld [vmem:[#allocation8 + $0x2c0] ss:$16 sps:$4 sm:$0xff]  }
  0x40   :  { %v1539_v28 = vld [vmem:[#allocation8 + $0xa4] ss:$16 sps:$4 sm:$0xff]   ;;  %v1537_v30 = vld [vmem:[#allocation8 + $0xa0] ss:$16 sps:$4 sm:$0xff]  }
  0x41   :  { %218 = vmatpush1.bf16.msra.mxu0 %v1517_v12  ;;  %v1542_v29 = vld [vmem:[#allocation8 + $0x2a4] ss:$16 sps:$4 sm:$0xff]   ;;  %v1540_v31 = vld [vmem:[#allocation8 + $0x2a0] ss:$16 sps:$4 sm:$0xff]  }
  0x42   :  { %259 = vmatpush1.bf16.msra.mxu1 %v1518_v13  ;;  %219 = vmatprep.subr.bf16.mxu0 %v1519_v14  ;;  %v1545_v32 = vld [vmem:[#allocation8 + $0x84] ss:$16 sps:$4 sm:$0xff]   ;;  %v1543_v34 = vld [vmem:[#allocation8 + $0x80] ss:$16 sps:$4 sm:$0xff]  }
  0x43   :  { %260 = vmatprep.subr.bf16.mxu1 %v1521_v15  ;;  %v1548_v33 = vld [vmem:[#allocation8 + $0x284] ss:$16 sps:$4 sm:$0xff]   ;;  %v1546_v35 = vld [vmem:[#allocation8 + $0x280] ss:$16 sps:$4 sm:$0xff]  }
  0x44   :  { %v1551_v36 = vld [vmem:[#allocation8 + $0x64] ss:$16 sps:$4 sm:$0xff]   ;;  %v1549_v38 = vld [vmem:[#allocation8 + $0x60] ss:$16 sps:$4 sm:$0xff]  }
  0x45   :  { %220 = vmatpush1.bf16.msra.mxu0 %v1523_v16  ;;  %v1554_v37 = vld [vmem:[#allocation8 + $0x264] ss:$16 sps:$4 sm:$0xff]   ;;  %v1552_v39 = vld [vmem:[#allocation8 + $0x260] ss:$16 sps:$4 sm:$0xff]  }
  0x46   :  { %261 = vmatpush1.bf16.msra.mxu1 %v1524_v17  ;;  %1097 = vmatprep.subr.bf16.mxu0 %v1527_v19  ;;  %v1557_v40 = vld [vmem:[#allocation8 + $0x44] ss:$16 sps:$4 sm:$0xff]   ;;  %v1555_v42 = vld [vmem:[#allocation8 + $0x40] ss:$16 sps:$4 sm:$0xff]  }
  0x47   :  { %1138 = vmatprep.subr.bf16.mxu1 %v1530_v20  ;;  %v1560_v41 = vld [vmem:[#allocation8 + $0x244] ss:$16 sps:$4 sm:$0xff]   ;;  %v1558_v43 = vld [vmem:[#allocation8 + $0x240] ss:$16 sps:$4 sm:$0xff]   ;;  %v1623_v20 = vld [vmem:[#allocation8 + $0xec] ss:$16 sps:$4 sm:$0xff]  }
  0x48   :  { %1362 = vmatmul.mubr.msk.bf16.vlgmr.msra.gmra.mxu0 %vm201_vm0, %v82_v21  ;;  %v1563_v44 = vld [vmem:[#allocation8 + $0x24] ss:$16 sps:$4 sm:$0xff]   ;;  %v1561_v46 = vld [vmem:[#allocation8 + $0x20] ss:$16 sps:$4 sm:$0xff]  }
  0x49   :  { %1363 = vmatmul.mubr.msk.bf16.vlgmr.msra.gmra.mxu1 %vm201_vm0, %v82_v21  ;;  %1098 = vmatpush1.bf16.msra.mxu0 %v1525_v22  ;;  %v1566_v45 = vld [vmem:[#allocation8 + $0x224] ss:$16 sps:$4 sm:$0xff]   ;;  %v1564_v47 = vld [vmem:[#allocation8 + $0x220] ss:$16 sps:$4 sm:$0xff]   ;;  %v1626_v21 = vld [vmem:[#allocation8 + $0x2ec] ss:$16 sps:$4 sm:$0xff]   ;;  %v101_v22 = vlaneseq }
  0x4a   :  { %1139 = vmatpush1.bf16.msra.mxu1 %v1528_v23  ;;  %1099 = vmatprep.subr.bf16.mxu0 %v1533_v24  ;;  %v1569_v48 = vld [vmem:[#allocation8 + $0x4] ss:$16 sps:$4 sm:$0xff]   ;;  %v1567_v50 = vld [vmem:[#allocation8] ss:$16 sps:$4 sm:$0xff]  }
  0x4b   :  { %1140 = vmatprep.subr.bf16.mxu1 %v1536_v25  ;;  %v1572_v49 = vld [vmem:[#allocation8 + $0x204] ss:$16 sps:$4 sm:$0xff]   ;;  %v1570_v51 = vld [vmem:[#allocation8 + $0x200] ss:$16 sps:$4 sm:$0xff]   ;;  %v1905_v23 = vshrl.u32 %v101_v22, 7 }
  0x4c   :  { %v1575_v52 = vld [vmem:[#allocation8 + $0x1e4] ss:$16 sps:$4 sm:$0xff]   ;;  %v1573_v54 = vld [vmem:[#allocation8 + $0x1e0] ss:$16 sps:$4 sm:$0xff]  }
  0x4d   :  { %1100 = vmatpush1.bf16.msra.mxu0 %v1531_v26  ;;  %v1578_v53 = vld [vmem:[#allocation8 + $0x3e4] ss:$16 sps:$4 sm:$0xff]   ;;  %v1576_v55 = vld [vmem:[#allocation8 + $0x3e0] ss:$16 sps:$4 sm:$0xff]   ;;  %v1908_v24 = vsub.s32 0, %v1905_v23  ;;  %v1911_v25 = vsub.s32 2, %v1905_v23 }
  0x4e   :  { %1141 = vmatpush1.bf16.msra.mxu1 %v1534_v27  ;;  %1101 = vmatprep.subr.bf16.mxu0 %v1539_v28  ;;  %v1581_v56 = vld [vmem:[#allocation8 + $0x1c4] ss:$16 sps:$4 sm:$0xff]   ;;  %v1579_v58 = vld [vmem:[#allocation8 + $0x1c0] ss:$16 sps:$4 sm:$0xff]   ;;  %v1917_v27 = vsub.s32 1, %v1905_v23  ;;  %v1920_v28 = vsub.s32 3, %v1905_v23 }
  0x4f   :  { %1142 = vmatprep.subr.bf16.mxu1 %v1542_v29  ;;  %v1584_v57 = vld [vmem:[#allocation8 + $0x3c4] ss:$16 sps:$4 sm:$0xff]   ;;  %v1582_v59 = vld [vmem:[#allocation8 + $0x3c0] ss:$16 sps:$4 sm:$0xff]  }
  0x50   :  { %v1587_v60 = vld [vmem:[#allocation8 + $0x1a4] ss:$16 sps:$4 sm:$0xff]   ;;  %v1585_v62 = vld [vmem:[#allocation8 + $0x1a0] ss:$16 sps:$4 sm:$0xff]  }
  0x51   :  { %1102 = vmatpush1.bf16.msra.mxu0 %v1537_v30  ;;  %v1590_v61 = vld [vmem:[#allocation8 + $0x3a4] ss:$16 sps:$4 sm:$0xff]   ;;  %v1588_v63 = vld [vmem:[#allocation8 + $0x3a0] ss:$16 sps:$4 sm:$0xff]  }
  0x52   :  { %1143 = vmatpush1.bf16.msra.mxu1 %v1540_v31  ;;  %1103 = vmatprep.subr.bf16.mxu0 %v1545_v32  ;;  %v1593_v0 = vld [vmem:[#allocation8 + $0x184] ss:$16 sps:$4 sm:$0xff]   ;;  %v1591_v2 = vld [vmem:[#allocation8 + $0x180] ss:$16 sps:$4 sm:$0xff]  }
  0x53   :  { %1144 = vmatprep.subr.bf16.mxu1 %v1548_v33  ;;  %v1596_v1 = vld [vmem:[#allocation8 + $0x384] ss:$16 sps:$4 sm:$0xff]   ;;  %v1594_v3 = vld [vmem:[#allocation8 + $0x380] ss:$16 sps:$4 sm:$0xff]  }
  0x54   :  { %v1599_v4 = vld [vmem:[#allocation8 + $0x164] ss:$16 sps:$4 sm:$0xff]   ;;  %v1597_v6 = vld [vmem:[#allocation8 + $0x160] ss:$16 sps:$4 sm:$0xff]  }
  0x55   :  { %1104 = vmatpush1.bf16.msra.mxu0 %v1543_v34  ;;  %v1602_v5 = vld [vmem:[#allocation8 + $0x364] ss:$16 sps:$4 sm:$0xff]   ;;  %v1600_v7 = vld [vmem:[#allocation8 + $0x360] ss:$16 sps:$4 sm:$0xff]  }
  0x56   :  { %1145 = vmatpush1.bf16.msra.mxu1 %v1546_v35  ;;  %1105 = vmatprep.subr.bf16.mxu0 %v1551_v36  ;;  %v1605_v8 = vld [vmem:[#allocation8 + $0x144] ss:$16 sps:$4 sm:$0xff]   ;;  %v1603_v10 = vld [vmem:[#allocation8 + $0x140] ss:$16 sps:$4 sm:$0xff]  }
  0x57   :  { %1146 = vmatprep.subr.bf16.mxu1 %v1554_v37  ;;  %v1608_v9 = vld [vmem:[#allocation8 + $0x344] ss:$16 sps:$4 sm:$0xff]   ;;  %v1606_v11 = vld [vmem:[#allocation8 + $0x340] ss:$16 sps:$4 sm:$0xff]  }
  0x58   :  { %v1611_v12 = vld [vmem:[#allocation8 + $0x124] ss:$16 sps:$4 sm:$0xff]   ;;  %v1609_v14 = vld [vmem:[#allocation8 + $0x120] ss:$16 sps:$4 sm:$0xff]  }
  0x59   :  { %1106 = vmatpush1.bf16.msra.mxu0 %v1549_v38  ;;  %v1614_v13 = vld [vmem:[#allocation8 + $0x324] ss:$16 sps:$4 sm:$0xff]   ;;  %v1612_v15 = vld [vmem:[#allocation8 + $0x320] ss:$16 sps:$4 sm:$0xff]  }
  0x5a   :  { %1147 = vmatpush1.bf16.msra.mxu1 %v1552_v39  ;;  %1107 = vmatprep.subr.bf16.mxu0 %v1557_v40  ;;  %v1617_v16 = vld [vmem:[#allocation8 + $0x104] ss:$16 sps:$4 sm:$0xff]   ;;  %v1615_v18 = vld [vmem:[#allocation8 + $0x100] ss:$16 sps:$4 sm:$0xff]  }
  0x5b   :  { %1148 = vmatprep.subr.bf16.mxu1 %v1560_v41  ;;  %v1620_v17 = vld [vmem:[#allocation8 + $0x304] ss:$16 sps:$4 sm:$0xff]   ;;  %v1618_v19 = vld [vmem:[#allocation8 + $0x300] ss:$16 sps:$4 sm:$0xff]  }
  0x5c   :  { %v99_v26 = vld [vmem:[%s1953_s2] sm:$0xf] }
  0x5d   :  { %1108 = vmatpush1.bf16.msra.mxu0 %v1555_v42  ;;  %v104_v29 = vrot.slane %v99_v26, %v1908_v24  ;;  %v112_v30 = vrot.slane %v99_v26, %v1911_v25  ;;  %v108_v31 = vrot.slane %v99_v26, %v1917_v27  ;;  %v116_v32 = vrot.slane %v99_v26, %v1920_v28  ;;  %v1654_v26 = vld [vmem:[#allocation8 + $0x248] ss:$16 sps:$4 sm:$0xff]  }
  0x5e   :  { %1149 = vmatpush1.bf16.msra.mxu1 %v1558_v43  ;;  %1109 = vmatprep.subr.bf16.mxu0 %v1563_v44 }
  0x5f   :  { %1150 = vmatprep.subr.bf16.mxu1 %v1566_v45 }
  0x61   :  { %1110 = vmatpush1.bf16.msra.mxu0 %v1561_v46 }
  0x62   :  { %1151 = vmatpush1.bf16.msra.mxu1 %v1564_v47  ;;  %1111 = vmatprep.subr.bf16.mxu0 %v1569_v48 }
  0x63   :  { %1152 = vmatprep.subr.bf16.mxu1 %v1572_v49 }
  0x65   :  { %1112 = vmatpush1.bf16.msra.mxu0 %v1567_v50 }
  0x66   :  { %1153 = vmatpush1.bf16.msra.mxu1 %v1570_v51  ;;  %1113 = vmatprep.subr.bf16.mxu0 %v1575_v52 }
  0x67   :  { %1154 = vmatprep.subr.bf16.mxu1 %v1578_v53 }
  0x69   :  { %1114 = vmatpush2.bf16.msra.mxu0 %v1573_v54 }
  0x6a   :  { %1155 = vmatpush2.bf16.msra.mxu1 %v1576_v55  ;;  %1115 = vmatprep.subr.bf16.mxu0 %v1581_v56 }
  0x6b   :  { %1156 = vmatprep.subr.bf16.mxu1 %v1584_v57 }
  0x6d   :  { %1116 = vmatpush2.bf16.msra.mxu0 %v1579_v58 }
  0x6e   :  { %1157 = vmatpush2.bf16.msra.mxu1 %v1582_v59  ;;  %1117 = vmatprep.subr.bf16.mxu0 %v1587_v60 }
  0x6f   :  { %1158 = vmatprep.subr.bf16.mxu1 %v1590_v61 }
  0x71   :  { %1118 = vmatpush2.bf16.msra.mxu0 %v1585_v62 }
  0x72   :  { %1159 = vmatpush2.bf16.msra.mxu1 %v1588_v63  ;;  %1119 = vmatprep.subr.bf16.mxu0 %v1593_v0  ;;  %v1621_v63 = vld [vmem:[#allocation8 + $0xe8] ss:$16 sps:$4 sm:$0xff]  }
  0x73   :  { %1160 = vmatprep.subr.bf16.mxu1 %v1596_v1 }
  0x75   :  { %1120 = vmatpush2.bf16.msra.mxu0 %v1591_v2  ;;  %v1624_v2 = vld [vmem:[#allocation8 + $0x2e8] ss:$16 sps:$4 sm:$0xff]  }
  0x76   :  { %1161 = vmatpush2.bf16.msra.mxu1 %v1594_v3  ;;  %1121 = vmatprep.subr.bf16.mxu0 %v1599_v4  ;;  %v1629_v3 = vld [vmem:[#allocation8 + $0xcc] ss:$16 sps:$4 sm:$0xff]  }
  0x77   :  { %1162 = vmatprep.subr.bf16.mxu1 %v1602_v5  ;;  %v1632_v4 = vld [vmem:[#allocation8 + $0x2cc] ss:$16 sps:$4 sm:$0xff]   ;;  %v1627_v5 = vld [vmem:[#allocation8 + $0xc8] ss:$16 sps:$4 sm:$0xff]  }
  0x79   :  { %1122 = vmatpush2.bf16.msra.mxu0 %v1597_v6  ;;  %v1630_v6 = vld [vmem:[#allocation8 + $0x2c8] ss:$16 sps:$4 sm:$0xff]  }
  0x7a   :  { %1163 = vmatpush2.bf16.msra.mxu1 %v1600_v7  ;;  %1123 = vmatprep.subr.bf16.mxu0 %v1605_v8  ;;  %v1635_v7 = vld [vmem:[#allocation8 + $0xac] ss:$16 sps:$4 sm:$0xff]  }
  0x7b   :  { %1164 = vmatprep.subr.bf16.mxu1 %v1608_v9  ;;  %v1638_v8 = vld [vmem:[#allocation8 + $0x2ac] ss:$16 sps:$4 sm:$0xff]   ;;  %v1633_v9 = vld [vmem:[#allocation8 + $0xa8] ss:$16 sps:$4 sm:$0xff]  }
  0x7d   :  { %1124 = vmatpush2.bf16.msra.mxu0 %v1603_v10  ;;  %v1636_v10 = vld [vmem:[#allocation8 + $0x2a8] ss:$16 sps:$4 sm:$0xff]  }
  0x7e   :  { %1165 = vmatpush2.bf16.msra.mxu1 %v1606_v11  ;;  %1125 = vmatprep.subr.bf16.mxu0 %v1611_v12  ;;  %v1641_v11 = vld [vmem:[#allocation8 + $0x8c] ss:$16 sps:$4 sm:$0xff]  }
  0x7f   :  { %1166 = vmatprep.subr.bf16.mxu1 %v1614_v13  ;;  %v1644_v12 = vld [vmem:[#allocation8 + $0x28c] ss:$16 sps:$4 sm:$0xff]   ;;  %v1639_v13 = vld [vmem:[#allocation8 + $0x88] ss:$16 sps:$4 sm:$0xff]  }
  0x81   :  { %1126 = vmatpush2.bf16.msra.mxu0 %v1609_v14  ;;  %v1642_v14 = vld [vmem:[#allocation8 + $0x288] ss:$16 sps:$4 sm:$0xff]  }
  0x82   :  { %1167 = vmatpush2.bf16.msra.mxu1 %v1612_v15  ;;  %1127 = vmatprep.subr.bf16.mxu0 %v1617_v16  ;;  %v1647_v15 = vld [vmem:[#allocation8 + $0x6c] ss:$16 sps:$4 sm:$0xff]  }
  0x83   :  { %1168 = vmatprep.subr.bf16.mxu1 %v1620_v17  ;;  %v1650_v16 = vld [vmem:[#allocation8 + $0x26c] ss:$16 sps:$4 sm:$0xff]   ;;  %v1645_v17 = vld [vmem:[#allocation8 + $0x68] ss:$16 sps:$4 sm:$0xff]  }
  0x85   :  { %1128 = vmatpush2.bf16.msra.mxu0 %v1615_v18  ;;  %v1648_v18 = vld [vmem:[#allocation8 + $0x268] ss:$16 sps:$4 sm:$0xff]  }
  0x86   :  { %1169 = vmatpush2.bf16.msra.mxu1 %v1618_v19  ;;  %1179 = vmatprep.subr.bf16.mxu0 %v1623_v20  ;;  %v1653_v19 = vld [vmem:[#allocation8 + $0x4c] ss:$16 sps:$4 sm:$0xff]  }
  0x87   :  { %1220 = vmatprep.subr.bf16.mxu1 %v1626_v21  ;;  %v1656_v20 = vld [vmem:[#allocation8 + $0x24c] ss:$16 sps:$4 sm:$0xff]   ;;  %v1651_v21 = vld [vmem:[#allocation8 + $0x48] ss:$16 sps:$4 sm:$0xff]  }
 0x108   :  { %v239_v33 = vpop.f32.mrf.mxu0 }
 0x109   :  { %v280_v34 = vpop.f32.mrf.mxu1  ;;  %v240_v35 = vadd.f32 %v239_v33, %v104_v29  ;;  %v1659_v29 = vld [vmem:[#allocation8 + $0x2c] ss:$16 sps:$4 sm:$0xff]  }
 0x10a   :  { %v281_v36 = vadd.f32 %v280_v34, %v112_v30  ;;  %v241_v37 = vpop.f32.mrf.mxu0  ;;  %v1662_v30 = vld [vmem:[#allocation8 + $0x22c] ss:$16 sps:$4 sm:$0xff]  }
 0x10b   :  { %v282_v38 = vpop.f32.mrf.mxu1  ;;  %v287_v39 = vmul.f32 0.5, %v240_v35  ;;  %v242_v41 = vadd.f32 %v241_v37, %v108_v31  ;;  %v1657_v31 = vld [vmem:[#allocation8 + $0x28] ss:$16 sps:$4 sm:$0xff]   ;;  %v1665_v33 = vld [vmem:[#allocation8 + $0xc] ss:$16 sps:$4 sm:$0xff]  }
 0x10c   :  { %v289_v40 = vmul.f32 0.5, %v281_v36  ;;  %v283_v42 = vadd.f32 %v282_v38, %v116_v32  ;;  %v243_v43 = vpop.f32.mrf.mxu0  ;;  %v1660_v32 = vld [vmem:[#allocation8 + $0x228] ss:$16 sps:$4 sm:$0xff]   ;;  %v1668_v34 = vld [vmem:[#allocation8 + $0x20c] ss:$16 sps:$4 sm:$0xff]  }
 0x10d   :  { %v284_v44 = vpop.f32.mrf.mxu1  ;;  %1717 = vtanh.f32 %v287_v39  ;;  %v288_v45 = vmul.f32 0.5, %v242_v41  ;;  %v1663_v35 = vld [vmem:[#allocation8 + $0x8] ss:$16 sps:$4 sm:$0xff]   ;;  %v1671_v37 = vld [vmem:[#allocation8 + $0x1ec] ss:$16 sps:$4 sm:$0xff]  }
 0x10e   :  { %v290_v46 = vmul.f32 0.5, %v283_v42  ;;  %1719 = vtanh.f32 %v289_v40  ;;  %v244_v47 = vpop.f32.mrf.mxu0  ;;  %v1666_v36 = vld [vmem:[#allocation8 + $0x208] ss:$16 sps:$4 sm:$0xff]   ;;  %v1674_v38 = vld [vmem:[#allocation8 + $0x3ec] ss:$16 sps:$4 sm:$0xff]  }
 0x10f   :  { %v285_v48 = vpop.f32.mrf.mxu1  ;;  %1721 = vtanh.f32 %v288_v45  ;;  %v1669_v39 = vld [vmem:[#allocation8 + $0x1e8] ss:$16 sps:$4 sm:$0xff]   ;;  %v1677_v41 = vld [vmem:[#allocation8 + $0x1cc] ss:$16 sps:$4 sm:$0xff]  }
 0x110   :  { %1723 = vtanh.f32 %v290_v46  ;;  %v1672_v40 = vld [vmem:[#allocation8 + $0x3e8] ss:$16 sps:$4 sm:$0xff]   ;;  %v1680_v42 = vld [vmem:[#allocation8 + $0x3cc] ss:$16 sps:$4 sm:$0xff]  }
 0x111   :  { %v1675_v43 = vld [vmem:[#allocation8 + $0x1c8] ss:$16 sps:$4 sm:$0xff]   ;;  %v1683_v45 = vld [vmem:[#allocation8 + $0x1ac] ss:$16 sps:$4 sm:$0xff]  }
 0x112   :  { %v1678_v44 = vld [vmem:[#allocation8 + $0x3c8] ss:$16 sps:$4 sm:$0xff]   ;;  %v1686_v46 = vld [vmem:[#allocation8 + $0x3ac] ss:$16 sps:$4 sm:$0xff]  }
 0x113   :  { %v1681_v47 = vld [vmem:[#allocation8 + $0x1a8] ss:$16 sps:$4 sm:$0xff]  }
 0x114   :  { %v1684_v48 = vld [vmem:[#allocation8 + $0x3a8] ss:$16 sps:$4 sm:$0xff]  }
 0x11a   :  { %v1718_v49 = vpop.eup %1717 }
 0x11b   :  { %v1720_v50 = vpop.eup %1719  ;;  %v295_v51 = vmul.f32 0.5, %v1718_v49  ;;  %v1689_v49 = vld [vmem:[#allocation8 + $0x18c] ss:$16 sps:$4 sm:$0xff]  }
 0x11c   :  { %v1722_v52 = vpop.eup %1721  ;;  %v297_v53 = vmul.f32 0.5, %v1720_v50  ;;  %v1692_v50 = vld [vmem:[#allocation8 + $0x38c] ss:$16 sps:$4 sm:$0xff]  }
 0x11d   :  { %v1724_v54 = vpop.eup %1723  ;;  %v296_v55 = vmul.f32 0.5, %v1722_v52  ;;  %v299_v56 = vadd.f32 0.5, %v295_v51  ;;  %v1687_v51 = vld [vmem:[#allocation8 + $0x188] ss:$16 sps:$4 sm:$0xff]  }
 0x11e   :  { %v301_v57 = vadd.f32 0.5, %v297_v53  ;;  %v298_v58 = vmul.f32 0.5, %v1724_v54  ;;  %v1690_v52 = vld [vmem:[#allocation8 + $0x388] ss:$16 sps:$4 sm:$0xff]   ;;  %v1695_v53 = vld [vmem:[#allocation8 + $0x16c] ss:$16 sps:$4 sm:$0xff]  }
 0x11f   :  { %v300_v59 = vadd.f32 0.5, %v296_v55  ;;  %v1928_v0 = vpack.c.bf16 %v299_v56, %v299_v56  ;;  %v1698_v54 = vld [vmem:[#allocation8 + $0x36c] ss:$16 sps:$4 sm:$0xff]   ;;  %v1693_v55 = vld [vmem:[#allocation8 + $0x168] ss:$16 sps:$4 sm:$0xff]  }
 0x120   :  { %v302_v60 = vadd.f32 0.5, %v298_v58  ;;  %v1926_v61 = vpack.c.bf16 %v301_v57, %v301_v57  ;;  %v1696_v56 = vld [vmem:[#allocation8 + $0x368] ss:$16 sps:$4 sm:$0xff]   ;;  %v1701_v57 = vld [vmem:[#allocation8 + $0x14c] ss:$16 sps:$4 sm:$0xff]  }
 0x121   :  { %v304_v62 = vpack.c.bf16 %v300_v59, %v300_v59  ;;  %v1704_v58 = vld [vmem:[#allocation8 + $0x34c] ss:$16 sps:$4 sm:$0xff]   ;;  %v1699_v59 = vld [vmem:[#allocation8 + $0x148] ss:$16 sps:$4 sm:$0xff]  }
 0x122   :  { %v306_v1 = vpack.c.bf16 %v302_v60, %v302_v60  ;;  %v1702_v60 = vld [vmem:[#allocation8 + $0x348] ss:$16 sps:$4 sm:$0xff]  }
 0x123   :  { %1129 = vmatprep.mubr.bf16.mxu0 %v304_v62 }
 0x124   :  { %1170 = vmatprep.mubr.bf16.mxu1 %v306_v1  ;;  %1130 = vmatmul.mubr.bf16.vlgmr.msra.gmra.mxu0 %v1928_v0 }
 0x125   :  { %1171 = vmatmul.mubr.bf16.vlgmr.msra.gmra.mxu1 %v1926_v61  ;;  %1180 = vmatpush1.bf16.msra.mxu0 %v1621_v63  ;;  %v1710_v63 = vld [vmem:[#allocation8 + $0x32c] ss:$16 sps:$4 sm:$0xff]  }
 0x126   :  { %1221 = vmatpush1.bf16.msra.mxu1 %v1624_v2  ;;  %1211 = vmatprep.mubr.bf16.mxu0 %v304_v62  ;;  %v1707_v62 = vld [vmem:[#allocation8 + $0x12c] ss:$16 sps:$4 sm:$0xff]   ;;  %v1708_v2 = vld [vmem:[#allocation8 + $0x328] ss:$16 sps:$4 sm:$0xff]  }
 0x127   :  { %1252 = vmatprep.mubr.bf16.mxu1 %v306_v1  ;;  %1181 = vmatprep.subr.bf16.mxu0 %v1629_v3  ;;  %v1705_v1 = vld [vmem:[#allocation8 + $0x128] ss:$16 sps:$4 sm:$0xff]   ;;  %v1713_v3 = vld [vmem:[#allocation8 + $0x10c] ss:$16 sps:$4 sm:$0xff]  }
 0x128   :  { %1222 = vmatprep.subr.bf16.mxu1 %v1632_v4  ;;  %v1716_v4 = vld [vmem:[#allocation8 + $0x30c] ss:$16 sps:$4 sm:$0xff]  }
 0x129   :  { %1182 = vmatpush1.bf16.msra.mxu0 %v1627_v5  ;;  %v1711_v5 = vld [vmem:[#allocation8 + $0x108] ss:$16 sps:$4 sm:$0xff]  }
 0x12a   :  { %1223 = vmatpush1.bf16.msra.mxu1 %v1630_v6  ;;  %1183 = vmatprep.subr.bf16.mxu0 %v1635_v7  ;;  %v1714_v6 = vld [vmem:[#allocation8 + $0x308] ss:$16 sps:$4 sm:$0xff]  }
 0x12b   :  { %1224 = vmatprep.subr.bf16.mxu1 %v1638_v8 }
 0x12d   :  { %1184 = vmatpush1.bf16.msra.mxu0 %v1633_v9 }
 0x12e   :  { %1225 = vmatpush1.bf16.msra.mxu1 %v1636_v10  ;;  %1185 = vmatprep.subr.bf16.mxu0 %v1641_v11 }
 0x12f   :  { %1226 = vmatprep.subr.bf16.mxu1 %v1644_v12 }
 0x131   :  { %1186 = vmatpush1.bf16.msra.mxu0 %v1639_v13 }
 0x132   :  { %1227 = vmatpush1.bf16.msra.mxu1 %v1642_v14  ;;  %1187 = vmatprep.subr.bf16.mxu0 %v1647_v15  ;;  %v435_v15 = vld [vmem:[%s1955_s4] sm:$0xf]  ;;  %s1848_s4 = smov [#allocation11]  }
 0x133   :  { %1228 = vmatprep.subr.bf16.mxu1 %v1650_v16  ;;  %v444_v16 = vrot.slane %v435_v15, %v1917_v27  ;;  %s1335_s23 = sshll.u32 %s1848_s4, 4  ;;  %s1336_s23 = int_to_ptr.vmem [resolvable:$true] %s1335_s23 }
 0x134   :  { %s1813_s24 = scalar_lea.vmem %s1336_s23, 16  ;;  %s1817_s25 = scalar_lea.vmem %s1336_s23, 32 }
 0x135   :  { %1188 = vmatpush1.bf16.msra.mxu0 %v1645_v17  ;;  %v440_v17 = vrot.slane %v435_v15, %v1908_v24  ;;  %p1814_p6 = scmp.ne.s32.totalorder %s1336_s23, %s1813_s24  ;;  %p1818_p7 = scmp.lt.s32.totalorder %s1336_s23, %s1336_s23 }
 0x136   :  { %1229 = vmatpush1.bf16.msra.mxu1 %v1648_v18  ;;  %1189 = vmatprep.subr.bf16.mxu0 %v1653_v19  ;;  %p1819_p8 = scmp.lt.s32.totalorder %s1817_s25, %s1813_s24 }
 0x137   :  { %1230 = vmatprep.subr.bf16.mxu1 %v1656_v20 }
 0x138   :  { %p1820_p9 = por %p1819_p8, %p1818_p7 }
 0x139   :  { %1190 = vmatpush1.bf16.msra.mxu0 %v1651_v21 }
 0x13a   :  { %1231 = vmatpush1.bf16.msra.mxu1 %v1654_v26  ;;  %1191 = vmatprep.subr.bf16.mxu0 %v1659_v29  ;;  %v448_v26 = vrot.slane %v435_v15, %v1911_v25  ;;  %v452_v29 = vrot.slane %v435_v15, %v1920_v28  ;;  %p1821_p10 = pnand %p1820_p9, %p1814_p6 }
 0x13b   :  { %1232 = vmatprep.subr.bf16.mxu1 %v1662_v30 }
 0x13d   :  { %1192 = vmatpush1.bf16.msra.mxu0 %v1657_v31 }
 0x13e   :  { %1233 = vmatpush1.bf16.msra.mxu1 %v1660_v32  ;;  %1193 = vmatprep.subr.bf16.mxu0 %v1665_v33 }
 0x13f   :  { %1234 = vmatprep.subr.bf16.mxu1 %v1668_v34 }
 0x141   :  { %1194 = vmatpush1.bf16.msra.mxu0 %v1663_v35 }
 0x142   :  { %1235 = vmatpush1.bf16.msra.mxu1 %v1666_v36  ;;  %1195 = vmatprep.subr.bf16.mxu0 %v1671_v37 }
 0x143   :  { %1236 = vmatprep.subr.bf16.mxu1 %v1674_v38 }
 0x145   :  { %1196 = vmatpush2.bf16.msra.mxu0 %v1669_v39 }
 0x146   :  { %1237 = vmatpush2.bf16.msra.mxu1 %v1672_v40  ;;  %1197 = vmatprep.subr.bf16.mxu0 %v1677_v41 }
 0x147   :  { %1238 = vmatprep.subr.bf16.mxu1 %v1680_v42 }
 0x149   :  { %1198 = vmatpush2.bf16.msra.mxu0 %v1675_v43 }
 0x14a   :  { %1239 = vmatpush2.bf16.msra.mxu1 %v1678_v44  ;;  %1199 = vmatprep.subr.bf16.mxu0 %v1683_v45 }
 0x14b   :  { %1240 = vmatprep.subr.bf16.mxu1 %v1686_v46 }
 0x14d   :  { %1200 = vmatpush2.bf16.msra.mxu0 %v1681_v47 }
 0x14e   :  { %1241 = vmatpush2.bf16.msra.mxu1 %v1684_v48  ;;  %1201 = vmatprep.subr.bf16.mxu0 %v1689_v49  ;;  %v1277_v48 = vld [vmem:[#allocation9] sm:$0xf] }
 0x14f   :  { %1242 = vmatprep.subr.bf16.mxu1 %v1692_v50  ;;  %v1286_v50 = vrot.slane %v1277_v48, %v1917_v27 }
 0x151   :  { %1202 = vmatpush2.bf16.msra.mxu0 %v1687_v51 }
 0x152   :  { %1243 = vmatpush2.bf16.msra.mxu1 %v1690_v52  ;;  %1203 = vmatprep.subr.bf16.mxu0 %v1695_v53  ;;  %v1282_v52 = vrot.slane %v1277_v48, %v1908_v24 }
 0x153   :  { %1244 = vmatprep.subr.bf16.mxu1 %v1698_v54 }
 0x155   :  { %1204 = vmatpush2.bf16.msra.mxu0 %v1693_v55  ;;  %v1290_v55 = vrot.slane %v1277_v48, %v1911_v25 }
 0x156   :  { %1245 = vmatpush2.bf16.msra.mxu1 %v1696_v56  ;;  %1205 = vmatprep.subr.bf16.mxu0 %v1701_v57 }
 0x157   :  { %1246 = vmatprep.subr.bf16.mxu1 %v1704_v58 }
 0x159   :  { %1206 = vmatpush2.bf16.msra.mxu0 %v1699_v59 }
 0x15a   :  { %1247 = vmatpush2.bf16.msra.mxu1 %v1702_v60  ;;  %1207 = vmatprep.subr.bf16.mxu0 %v1707_v62  ;;  %v1294_v60 = vrot.slane %v1277_v48, %v1920_v28 }
 0x15b   :  { %1248 = vmatprep.subr.bf16.mxu1 %v1710_v63 }
 0x15d   :  { %1208 = vmatpush2.bf16.msra.mxu0 %v1705_v1 }
 0x15e   :  { %1249 = vmatpush2.bf16.msra.mxu1 %v1708_v2  ;;  %1209 = vmatprep.subr.bf16.mxu0 %v1713_v3 }
 0x15f   :  { %1250 = vmatprep.subr.bf16.mxu1 %v1716_v4 }
 0x161   :  { %1210 = vmatpush2.bf16.msra.mxu0 %v1711_v5  ;;  %v1308_v5 = vld [vmem:[#allocation2] sm:$0x1] }
 0x162   :  { %1251 = vmatpush2.bf16.msra.mxu1 %v1714_v6 }
 0x164   :  { %1212 = vmatmul.mubr.bf16.vlgmr.msra.gmra.mxu0 %v1928_v0 }
 0x165   :  { %1253 = vmatmul.mubr.bf16.vlgmr.msra.gmra.mxu1 %v1926_v61 }
 0x1e4   :  { %v1131_v7 = vpop.f32.mrf.mxu0 }
 0x1e5   :  { %v1172_v8 = vpop.f32.mrf.mxu1  ;;  %v1132_v0 = vadd.f32 %v1131_v7, %v440_v17  ;;  %v1321_v7 = vand.u32 127, %v101_v22 }
 0x1e6   :  { %v1133_v9 = vpop.f32.mrf.mxu0 }
 0x1e7   :  { %v1174_v10 = vpop.f32.mrf.mxu1  ;;  %v1134_v18 = vadd.f32 %v1133_v9, %v444_v16  ;;  %v1173_v61 = vadd.f32 %v1172_v8, %v1132_v0  ;;  %v1324_v8 = vsub.s32 %v1321_v7, %v1905_v23 }
 0x1e8   :  { %v1135_v11 = vpop.f32.mrf.mxu0 }
 0x1e9   :  { %v1176_v12 = vpop.f32.mrf.mxu1  ;;  %v1175_v19 = vadd.f32 %v1174_v10, %v1134_v18  ;;  %v1261_v21 = vmul.f32 0.5, %v1173_v61 }
 0x1ea   :  { %v1136_v13 = vpop.f32.mrf.mxu0 }
 0x1eb   :  { %v1177_v14 = vpop.f32.mrf.mxu1  ;;  %v1262_v20 = vmul.f32 0.5, %v1175_v19 }
 0x1ed   :  { %1725 = vtanh.f32 %v1262_v20 }
 0x1ee   :  { %1727 = vtanh.f32 %v1261_v21 }
 0x1fa   :  { %v1726_v44 = vpop.eup %1725 }
 0x1fb   :  { %v1728_v45 = vpop.eup %1727  ;;  %v1270_v46 = vmul.f32 0.5, %v1726_v44 }
 0x1fc   :  { %v1269_v47 = vmul.f32 0.5, %v1728_v45 }
 0x1fd   :  { %v1274_v49 = vadd.f32 0.5, %v1270_v46 }
 0x1fe   :  { %v1273_v51 = vadd.f32 0.5, %v1269_v47 }
 0x1ff   :  { %v1300_v56 = vmul.f32 %v1286_v50, %v1274_v49 }
 0x200   :  { %v1299_v62 = vmul.f32 %v1282_v52, %v1273_v51 }
 0x202   :  { %v1303_v2 = vadd.f32 %v1300_v56, %v1299_v62 }
 0x224   :  { %v1213_v30 = vpop.f32.mrf.mxu0 }
 0x225   :  { %v1214_v31 = vadd.f32 %v1213_v30, %v448_v26  ;;  %v1254_v32 = vpop.f32.mrf.mxu1 }
 0x226   :  { %v1215_v33 = vpop.f32.mrf.mxu0 }
 0x227   :  { %v1255_v34 = vadd.f32 %v1254_v32, %v1214_v31  ;;  %v1216_v35 = vadd.f32 %v1215_v33, %v452_v29  ;;  %v1256_v36 = vpop.f32.mrf.mxu1 }
 0x228   :  { %v1217_v37 = vpop.f32.mrf.mxu0 }
 0x229   :  { %v1263_v38 = vmul.f32 0.5, %v1255_v34  ;;  %v1257_v39 = vadd.f32 %v1256_v36, %v1216_v35  ;;  %v1258_v40 = vpop.f32.mrf.mxu1 }
 0x22a   :  { %v1218_v41 = vpop.f32.mrf.mxu0 }
 0x22b   :  { %1729 = vtanh.f32 %v1263_v38  ;;  %v1264_v42 = vmul.f32 0.5, %v1257_v39  ;;  %v1259_v43 = vpop.f32.mrf.mxu1 }
 0x22d   :  { %1731 = vtanh.f32 %v1264_v42 }
 0x238   :  { %v1730_v53 = vpop.eup %1729 }
 0x239   :  { %v1271_v54 = vmul.f32 0.5, %v1730_v53 }
 0x23a   :  { %v1732_v57 = vpop.eup %1731 }
 0x23b   :  { %v1275_v58 = vadd.f32 0.5, %v1271_v54  ;;  %v1272_v59 = vmul.f32 0.5, %v1732_v57 }
 0x23d   :  { %v1276_v63 = vadd.f32 0.5, %v1272_v59  ;;  %v1301_v1 = vmul.f32 %v1290_v55, %v1275_v58 }
 0x23f   :  { %v1302_v3 = vmul.f32 %v1294_v60, %v1276_v63  ;;  %v1304_v4 = vadd.f32 %v1303_v2, %v1301_v1 }
 0x241   :  { %v1305_v27 = vadd.f32 %v1304_v4, %v1302_v3 }
 0x243   :  { %1306 = vadd.xlane.f32.xlu0 %v1305_v27 }
 0x259   :  { %1311 = vperm.xlu0 %1500, %v1308_v5  }
 0x2cc   :  { %v1307_v6 = vpop.xlane.xlu0 %1306 }
 0x2d4   :  { %v1312_v25 = vpop.permute.xlu0 %1311 }
 0x2d5   :  { %v1317_v9 = vrot.slane %v1312_v25, %v1908_v24 }
 0x2d7   :  { %v1318_v28 = vadd.f32 %v1317_v9, %v1307_v6 }
 0x2d9   :  { %v1325_v10 = vrot.slane %v1318_v28, %v1324_v8 }
 0x2db   :  { %1328 = vst.msk [vmem:[#allocation11] sm:$0x1] %vm1327_vm1, %v1325_v10 }
 0x2dc   :  { %1824 = shalt.err (!%p1821_p10)
}
 0x2dd   :  { %1338 = dma.vmem_to_hbm [thread:$0]  %s1336_s23, 16, %s1958_s7, [#allocation5]  }
 0x2de   :  { %1839 = dma.done.wait [#allocation5], 16  }
 0x2df   :  { %1840 = vsyncadd [#allocation5], 4294967280 }
 0x2e0   :  { %1342 = vsyncpa [#allocation4], 1 }
 0x2e1   :  { %1343 = vsyncpa [#allocation7], 1 }
 0x2e2   :  { %1344 = vsyncpa [#allocation10], 1 }
 0x2e3   :  { %1345 = vsyncpa [#allocation5], 1 }

</bundles_post_ra>
